<compile_context>
chip_gen: v5e
topology: v5e:2x2
jax: 0.10.0
libtpu: 0.0.40
codegen_flags: <defaults>
</compile_context>

<pallas_src>
import numpy as np
import jax
import jax.numpy as jnp
from jax.experimental import pallas as pl
from jax.experimental.pallas import tpu as pltpu


def lsa_kernel(q_ref, mem_ref, pmem_ref, slab_ref,
               wqT_ref, weff_ref, wv_ref,
               ctx_ref, attw_ref):
    Bt, T, A = pmem_ref.shape
    K2 = slab_ref.shape[2]
    E = mem_ref.shape[2]

    # processed_query: (Bt, R) @ (R, A) -> (Bt, A); one dense MXU push, bf16 in / f32 acc.
    pq = jnp.dot(q_ref[...], wqT_ref[...], preferred_element_type=jnp.float32)

    # fused location_conv + location_dense: (Bt*T, 2K) @ (2K, A) -> (Bt, T, A)
    loc = jnp.dot(slab_ref[...].reshape(Bt * T, K2), weff_ref[...],
                  preferred_element_type=jnp.float32).reshape(Bt, T, A)

    # energies = v . tanh(pq + loc + pmem)  (v.bias is softmax-shift-invariant -> dropped)
    h = jnp.tanh(pq[:, None, :] + loc + pmem_ref[...].astype(jnp.float32))   # (Bt, T, A)
    energies = jnp.sum(h * wv_ref[...], axis=-1)                             # (Bt, T), T on lanes

    # TODO(synk): memory mask / masked_fill repair loop and the training-time (epoch/step
    # gated) guided-attention and right-bias branches are host-side Python control flow;
    # only the inference path (mask=None, training=False) is implemented. If masking is
    # added, re-introduce the nan_to_num / eps-renormalisation here.

    # softmax over T (unmasked path: denominator >= 1, single exact normalization)
    m = jnp.max(energies, axis=-1, keepdims=True)
    e = jnp.exp(energies - m)
    w = e / jnp.sum(e, axis=-1, keepdims=True)                               # (Bt, T)
    attw_ref[...] = w.astype(attw_ref.dtype)

    # attention_context = weights @ memory -> (Bt, E); bf16 MXU inputs, f32 accumulation.
    ctx = jnp.einsum('bqt,bte->bqe',
                     w[:, None, :].astype(mem_ref.dtype), mem_ref[...],
                     preferred_element_type=jnp.float32)
    ctx_ref[...] = ctx.reshape(Bt, E).astype(ctx_ref.dtype)


def location_sensitive_attention(attention_hidden_state, memory, processed_memory,
                                 attention_weights_cat, params, *,
                                 b_tile=None, vmem_limit_bytes=None):
    B, T, E = memory.shape
    R = attention_hidden_state.shape[-1]
    A = params["Wq"].shape[0]
    F_n, _, K = params["conv_w"].shape
    P = (K - 1) // 2
    K2 = 2 * K

    if b_tile is None:
        # Prefer >=2 grid steps (lets dimension_semantics=("parallel",) shard the batch
        # across v7x's two TensorCores) with a sublane-aligned (multiple-of-8) batch tile.
        b_tile = 8 if (B % 8 == 0 and B > 8) else B
    assert B % b_tile == 0, "batch must be divisible by b_tile"

    # --- trace-time constant folding / layout glue (weights + tiny index shuffles only) ---
    # W_eff[(c*K+k), a] = sum_f conv_w[f, c, k] * Wloc[a, f]
    w_flat = jnp.transpose(params["conv_w"], (1, 2, 0)).reshape(K2, F_n)       # (2K, F)
    w_eff = (w_flat @ params["Wloc"].T).astype(jnp.bfloat16)                   # (2K, A) bf16
    wq_t = jnp.transpose(params["Wq"]).astype(jnp.bfloat16)                    # (R, A)  bf16
    wv2 = params["Wv"].reshape(1, A).astype(jnp.float32)                       # (1, A)  f32

    # im2col of the SAME-padded attention weights: slab[b,t,c*K+k] = x_pad[b,c,t+k]
    aw_pad = jnp.pad(attention_weights_cat, ((0, 0), (0, 0), (P, P)))          # (B, 2, T+K-1)
    cols = jnp.stack([aw_pad[:, :, k:k + T] for k in range(K)], axis=2)        # (B, 2, K, T)
    slab = jnp.transpose(cols, (0, 3, 1, 2)).reshape(B, T, K2).astype(jnp.bfloat16)

    q2 = attention_hidden_state.astype(jnp.bfloat16).reshape(B, R)

    # memory / processed_memory should be cast to bf16 ONCE by the caller (they are
    # loop-invariant across decoder steps); the casts below are no-ops in that case.
    mem_bf = memory if memory.dtype == jnp.bfloat16 else memory.astype(jnp.bfloat16)
    pmem_bf = (processed_memory if processed_memory.dtype == jnp.bfloat16
               else processed_memory.astype(jnp.bfloat16))

    grid_spec = pltpu.PrefetchScalarGridSpec(
        num_scalar_prefetch=0,
        grid=(B // b_tile,),
        in_specs=[
            pl.BlockSpec((b_tile, R), lambda g: (g, 0)),
            pl.BlockSpec((b_tile, T, E), lambda g: (g, 0, 0)),
            pl.BlockSpec((b_tile, T, A), lambda g: (g, 0, 0)),
            pl.BlockSpec((b_tile, T, K2), lambda g: (g, 0, 0)),
            pl.BlockSpec((R, A), lambda g: (0, 0)),
            pl.BlockSpec((K2, A), lambda g: (0, 0)),
            pl.BlockSpec((1, A), lambda g: (0, 0)),
        ],
        out_specs=[
            pl.BlockSpec((b_tile, E), lambda g: (g, 0)),
            pl.BlockSpec((b_tile, T), lambda g: (g, 0)),
        ],
    )
    ctx, attw = pl.pallas_call(
        lsa_kernel,
        out_shape=(jax.ShapeDtypeStruct((B, E), jnp.float32),
                   jax.ShapeDtypeStruct((B, T), jnp.float32)),
        grid_spec=grid_spec,
        compiler_params=pltpu.CompilerParams(
            dimension_semantics=("parallel",),
            vmem_limit_bytes=vmem_limit_bytes),
    )(q2, mem_bf, pmem_bf, slab, wq_t, w_eff, wv2)
    return ctx, attw


def reference(q, memory, pmem, aw_cat, params):
    """Pure-JAX f32 reference mirroring the PyTorch forward (mask=None, eval)."""
    K = params["conv_w"].shape[2]
    P = (K - 1) // 2
    pq = q @ params["Wq"].T                                        # (B, A)
    conv = jax.lax.conv_general_dilated(
        aw_cat, params["conv_w"], window_strides=(1,), padding=[(P, P)],
        dimension_numbers=("NCH", "OIH", "NCH"))                   # (B, F, T)
    loc = jnp.transpose(conv, (0, 2, 1)) @ params["Wloc"].T        # (B, T, A)
    h = jnp.tanh(pq[:, None, :] + loc + pmem)
    energies = (h @ params["Wv"].T + params["bv"]).squeeze(-1)     # (B, T)
    w = jax.nn.softmax(energies, axis=1)
    w = jnp.nan_to_num(w)
    w = w / (w.sum(axis=1, keepdims=True) + 1e-8)
    ctx = jnp.einsum("bt,bte->be", w, memory)
    return ctx, w


def xavier_uniform(key, shape):
    fan_out, fan_in = shape                      # torch Linear weight is (out, in)
    limit = float(np.sqrt(6.0 / (fan_in + fan_out)))
    return jax.random.uniform(key, shape, jnp.float32, -limit, limit)


if __name__ == "__main__":
    # attention_rnn_dim R, encoder_embedding_dim E, attention_dim A,
    # n_location_filters F, kernel_size K, encoder timesteps T, batch B
    B, R, E, A, F_n, K, T = 16, 32, 32, 16, 4, 5, 8

    key = jax.random.PRNGKey(0)
    ks = jax.random.split(key, 10)

    Wq = xavier_uniform(ks[0], (A, R))                     # query_layer.weight
    Wm = xavier_uniform(ks[1], (A, E))                     # memory_layer.weight
    Wv = xavier_uniform(ks[2], (1, A))                     # v.weight
    bv = jnp.full((1,), -1.0, jnp.float32)                 # v.bias (constant -1.0)
    Wloc = xavier_uniform(ks[3], (A, F_n))                 # location_dense.weight
    bound = 1.0 / float(np.sqrt(2 * K))                    # conv default-ish init
    conv_w = jax.random.uniform(ks[4], (F_n, 2, K), jnp.float32, -bound, bound)
    params = dict(Wq=Wq, conv_w=conv_w, Wloc=Wloc, Wv=Wv, bv=bv)

    attention_hidden_state = jax.random.normal(ks[5], (B, R), jnp.float32)
    memory = jax.random.normal(ks[6], (B, T, E), jnp.float32)
    processed_memory = jnp.einsum("bte,ae->bta", memory, Wm)          # memory_layer(memory)
    prev_w = jax.nn.softmax(jax.random.normal(ks[7], (B, T)), axis=-1)
    cum_w = jax.nn.softmax(jax.random.normal(ks[8], (B, T)), axis=-1)
    attention_weights_cat = jnp.stack([prev_w, cum_w], axis=1)        # (B, 2, T)

    # Hoisted (loop-invariant across decoder steps): cast encoder-side tensors to bf16 once.
    memory_bf = memory.astype(jnp.bfloat16)
    processed_memory_bf = processed_memory.astype(jnp.bfloat16)

    ctx, attw = location_sensitive_attention(
        attention_hidden_state, memory_bf, processed_memory_bf, attention_weights_cat,
        params, b_tile=8)
    jax.block_until_ready((ctx, attw))

    ctx_ref, attw_ref = reference(
        attention_hidden_state, memory, processed_memory, attention_weights_cat, params)
    # Tolerance accounts for bf16 end-to-end MXU operands (q, weights, slab, memory,
    # processed_memory) vs. the f32 reference; softmax normalization itself is exact.
    np.testing.assert_allclose(np.asarray(ctx), np.asarray(ctx_ref), rtol=5e-2, atol=5e-2)
    np.testing.assert_allclose(np.asarray(attw), np.asarray(attw_ref), rtol=5e-2, atol=5e-2)

    print("KERNEL_OK")
</pallas_src>

<mosaic_0001>
module attributes {stable_mosaic.version = 11 : i64} {
  func.func @lsa_kernel(%arg0: i32, %arg1: memref<8x32xbf16, #tpu.memory_space<vmem>>, %arg2: memref<8x8x32xbf16, #tpu.memory_space<vmem>>, %arg3: memref<8x8x16xbf16, #tpu.memory_space<vmem>>, %arg4: memref<8x8x10xbf16, #tpu.memory_space<vmem>>, %arg5: memref<32x16xbf16, #tpu.memory_space<vmem>>, %arg6: memref<10x16xbf16, #tpu.memory_space<vmem>>, %arg7: memref<1x16xf32, #tpu.memory_space<vmem>>, %arg8: memref<8x32xf32, #tpu.memory_space<vmem>>, %arg9: memref<8x8xf32, #tpu.memory_space<vmem>>) attributes {dimension_semantics = [#tpu.dimension_semantics<parallel>], iteration_bounds = array<i64: 2>, scalar_prefetch = 0 : i64, scratch_operands = 0 : i64, tpu.core_type = #tpu.core_type<tc>, window_params = [{transform_indices = @transform_0, window_bounds = array<i64: 8, 32>}, {transform_indices = @transform_1, window_bounds = array<i64: 8, 8, 32>}, {transform_indices = @transform_2, window_bounds = array<i64: 8, 8, 16>}, {transform_indices = @transform_3, window_bounds = array<i64: 8, 8, 10>}, {pipeline_mode = #tpu.pipeline_mode<synchronous>, transform_indices = @transform_4, window_bounds = array<i64: 32, 16>}, {pipeline_mode = #tpu.pipeline_mode<synchronous>, transform_indices = @transform_5, window_bounds = array<i64: 10, 16>}, {pipeline_mode = #tpu.pipeline_mode<synchronous>, transform_indices = @transform_6, window_bounds = array<i64: 1, 16>}, {transform_indices = @transform_7, window_bounds = array<i64: 8, 32>}, {transform_indices = @transform_8, window_bounds = array<i64: 8, 8>}]} {
    %c0 = arith.constant 0 : index
    %c0_0 = arith.constant 0 : index
    %0 = vector.load %arg1[%c0, %c0_0] : memref<8x32xbf16, #tpu.memory_space<vmem>>, vector<8x32xbf16>
    %c0_1 = arith.constant 0 : index
    %c0_2 = arith.constant 0 : index
    %1 = vector.load %arg5[%c0_1, %c0_2] : memref<32x16xbf16, #tpu.memory_space<vmem>>, vector<32x16xbf16>
    %cst = arith.constant dense<0.000000e+00> : vector<8x16xf32>
    %2 = tpu.matmul %0, %1, %cst {dimension_numbers = #tpu.dot_dimension_numbers<[1], [0], [0], [1], [0, 0, 1, 1], [], []>} : vector<8x32xbf16>, vector<32x16xbf16>, vector<8x16xf32> -> vector<8x16xf32>
    %c0_3 = arith.constant 0 : index
    %c0_4 = arith.constant 0 : index
    %c0_5 = arith.constant 0 : index
    %3 = vector.load %arg4[%c0_3, %c0_4, %c0_5] : memref<8x8x10xbf16, #tpu.memory_space<vmem>>, vector<8x8x10xbf16>
    %4 = vector.shape_cast %3 : vector<8x8x10xbf16> to vector<64x10xbf16>
    %c0_6 = arith.constant 0 : index
    %c0_7 = arith.constant 0 : index
    %5 = vector.load %arg6[%c0_6, %c0_7] : memref<10x16xbf16, #tpu.memory_space<vmem>>, vector<10x16xbf16>
    %cst_8 = arith.constant dense<0.000000e+00> : vector<64x16xf32>
    %6 = tpu.matmul %4, %5, %cst_8 {dimension_numbers = #tpu.dot_dimension_numbers<[1], [0], [0], [1], [0, 0, 1, 1], [], []>} : vector<64x10xbf16>, vector<10x16xbf16>, vector<64x16xf32> -> vector<64x16xf32>
    %7 = vector.shape_cast %6 : vector<64x16xf32> to vector<8x8x16xf32>
    %8 = vector.shape_cast %2 : vector<8x16xf32> to vector<8x1x16xf32>
    %9 = vector.broadcast %8 : vector<8x1x16xf32> to vector<8x8x16xf32>
    %10 = arith.addf %9, %7 : vector<8x8x16xf32>
    %c0_9 = arith.constant 0 : index
    %c0_10 = arith.constant 0 : index
    %c0_11 = arith.constant 0 : index
    %11 = vector.load %arg3[%c0_9, %c0_10, %c0_11] : memref<8x8x16xbf16, #tpu.memory_space<vmem>>, vector<8x8x16xbf16>
    %12 = arith.extf %11 : vector<8x8x16xbf16> to vector<8x8x16xf32>
    %13 = arith.addf %10, %12 : vector<8x8x16xf32>
    %14 = math.tanh %13 : vector<8x8x16xf32>
    %c0_12 = arith.constant 0 : index
    %c0_13 = arith.constant 0 : index
    %15 = vector.load %arg7[%c0_12, %c0_13] : memref<1x16xf32, #tpu.memory_space<vmem>>, vector<1x16xf32>
    %16 = vector.shape_cast %15 : vector<1x16xf32> to vector<1x1x16xf32>
    %17 = vector.broadcast %16 : vector<1x1x16xf32> to vector<8x8x16xf32>
    %18 = arith.mulf %14, %17 : vector<8x8x16xf32>
    %cst_14 = arith.constant dense<0.000000e+00> : vector<8x8xf32>
    %19 = vector.multi_reduction <add>, %18, %cst_14 [2] : vector<8x8x16xf32> to vector<8x8xf32>
    %cst_15 = arith.constant dense<0xFF800000> : vector<8xf32>
    %20 = vector.multi_reduction <maximumf>, %19, %cst_15 [1] : vector<8x8xf32> to vector<8xf32>
    %21 = vector.shape_cast %20 : vector<8xf32> to vector<8x1xf32>
    %22 = vector.broadcast %21 : vector<8x1xf32> to vector<8x8xf32>
    %23 = arith.subf %19, %22 : vector<8x8xf32>
    %24 = math.exp %23 : vector<8x8xf32>
    %cst_16 = arith.constant dense<0.000000e+00> : vector<8xf32>
    %25 = vector.multi_reduction <add>, %24, %cst_16 [1] : vector<8x8xf32> to vector<8xf32>
    %26 = vector.shape_cast %25 : vector<8xf32> to vector<8x1xf32>
    %27 = vector.broadcast %26 : vector<8x1xf32> to vector<8x8xf32>
    %28 = arith.divf %24, %27 : vector<8x8xf32>
    %c0_17 = arith.constant 0 : index
    %c0_18 = arith.constant 0 : index
    %29 = vector.load %arg9[%c0_17, %c0_18] : memref<8x8xf32, #tpu.memory_space<vmem>>, vector<8x8xf32>
    tpu.vector_store %arg9[%c0_17, %c0_18], %28 {strides = array<i32>} : memref<8x8xf32, #tpu.memory_space<vmem>>, vector<8x8xf32>,
    %30 = vector.shape_cast %28 : vector<8x8xf32> to vector<8x1x8xf32>
    %31 = arith.truncf %30 : vector<8x1x8xf32> to vector<8x1x8xbf16>
    %c0_19 = arith.constant 0 : index
    %c0_20 = arith.constant 0 : index
    %c0_21 = arith.constant 0 : index
    %32 = vector.load %arg2[%c0_19, %c0_20, %c0_21] : memref<8x8x32xbf16, #tpu.memory_space<vmem>>, vector<8x8x32xbf16>
    "tpu.trace_start"() <{level = 10 : i32, message = "bqt,bte->bqe"}> : () -> ()
    %cst_22 = arith.constant dense<0.000000e+00> : vector<8x1x32xf32>
    %33 = tpu.matmul %31, %32, %cst_22 {dimension_numbers = #tpu.dot_dimension_numbers<[2], [1], [1], [2], [0, 0, 0, 1, 1, 2], [0], [0]>} : vector<8x1x8xbf16>, vector<8x8x32xbf16>, vector<8x1x32xf32> -> vector<8x1x32xf32>
    "tpu.trace_stop"() : () -> ()
    %34 = vector.shape_cast %33 : vector<8x1x32xf32> to vector<8x32xf32>
    %c0_23 = arith.constant 0 : index
    %c0_24 = arith.constant 0 : index
    %35 = vector.load %arg8[%c0_23, %c0_24] : memref<8x32xf32, #tpu.memory_space<vmem>>, vector<8x32xf32>
    tpu.vector_store %arg8[%c0_23, %c0_24], %34 {strides = array<i32>} : memref<8x32xf32, #tpu.memory_space<vmem>>, vector<8x32xf32>,
    return
  }
  func.func @transform_0(%arg0: i32) -> (i32, i32) {
    %c0_i32 = arith.constant 0 : i32
    %c0_i32_0 = arith.constant 0 : i32
    return %arg0, %c0_i32 : i32, i32
  }
  func.func @transform_1(%arg0: i32) -> (i32, i32, i32) {
    %c0_i32 = arith.constant 0 : i32
    %c0_i32_0 = arith.constant 0 : i32
    %c0_i32_1 = arith.constant 0 : i32
    return %arg0, %c0_i32, %c0_i32_0 : i32, i32, i32
  }
  func.func @transform_2(%arg0: i32) -> (i32, i32, i32) {
    %c0_i32 = arith.constant 0 : i32
    %c0_i32_0 = arith.constant 0 : i32
    %c0_i32_1 = arith.constant 0 : i32
    return %arg0, %c0_i32, %c0_i32_0 : i32, i32, i32
  }
  func.func @transform_3(%arg0: i32) -> (i32, i32, i32) {
    %c0_i32 = arith.constant 0 : i32
    %c0_i32_0 = arith.constant 0 : i32
    %c0_i32_1 = arith.constant 0 : i32
    return %arg0, %c0_i32, %c0_i32_0 : i32, i32, i32
  }
  func.func @transform_4(%arg0: i32) -> (i32, i32) {
    %c0_i32 = arith.constant 0 : i32
    %c0_i32_0 = arith.constant 0 : i32
    %c0_i32_1 = arith.constant 0 : i32
    return %c0_i32, %c0_i32_0 : i32, i32
  }
  func.func @transform_5(%arg0: i32) -> (i32, i32) {
    %c0_i32 = arith.constant 0 : i32
    %c0_i32_0 = arith.constant 0 : i32
    %c0_i32_1 = arith.constant 0 : i32
    return %c0_i32, %c0_i32_0 : i32, i32
  }
  func.func @transform_6(%arg0: i32) -> (i32, i32) {
    %c0_i32 = arith.constant 0 : i32
    %c0_i32_0 = arith.constant 0 : i32
    %c0_i32_1 = arith.constant 0 : i32
    return %c0_i32, %c0_i32_0 : i32, i32
  }
  func.func @transform_7(%arg0: i32) -> (i32, i32) {
    %c0_i32 = arith.constant 0 : i32
    %c0_i32_0 = arith.constant 0 : i32
    return %arg0, %c0_i32 : i32, i32
  }
  func.func @transform_8(%arg0: i32) -> (i32, i32) {
    %c0_i32 = arith.constant 0 : i32
    %c0_i32_0 = arith.constant 0 : i32
    return %arg0, %c0_i32 : i32, i32
  }
}

</mosaic_0001>

<bundles_post_ra>
// kernel: tpu_custom_call.1
= control target key start
LH: loop header
LB: loop body
LE: loop exit
PB: predicated region body
PF: predicated region fallthrough
CT: control target
= control target key end

     0   :  { %s2243_s0 = inlined_call_operand.hbm [shape: bf16[16,32], index: 0, kind: input, shape index: {}]   ;;  %s2244_s1 = inlined_call_operand.vmem [shape: bf16[16,8,32], index: 1, kind: input, shape index: {}]   ;;  %s2245_s2 = inlined_call_operand.vmem [shape: bf16[16,8,16], index: 2, kind: input, shape index: {}]   ;;  %s2246_s3 = inlined_call_operand.vmem [shape: bf16[16,8,10], index: 3, kind: input, shape index: {}]   ;;  %s2247_s4 = inlined_call_operand.vmem [shape: bf16[32,16], index: 4, kind: input, shape index: {}]   ;;  %s2248_s5 = inlined_call_operand.hbm [shape: bf16[10,16], index: 5, kind: input, shape index: {}]   ;;  %s2249_s6 = inlined_call_operand.vmem [shape: f32[1,16], index: 6, kind: input, shape index: {}]   ;;  %s2250_s7 = inlined_call_operand.hbm [shape: f32[16,32], index: 7, kind: output, shape index: {0}]   ;;  %s2251_s8 = inlined_call_operand.vmem [shape: f32[16,8], index: 8, kind: output, shape index: {1}]  }
   0x1   :  { %2261 = sst [smem:[#allocation12_spill]] %s2248_s5 }
   0x2   :  { %14 = vsyncpa [#allocation3], 0 }
   0x3   :  { %16 = vsyncpa [#allocation3 + $0x1], 0 }
   0x4   :  { %17 = vsyncpa [#allocation6], 0 }
   0x5   :  { %18 = vsyncpa [#allocation4], 0 }
   0x6   :  { %20 = vsyncpa [#allocation4 + $0x1], 0  ;;  %s1766_s27 = smov 0   ;;  %s1768_s28 = smov 0  }
   0x7   :  { %s1770_s29 = smov 0   ;;  %s1772_s30 = smov 0  }
   0x8 LB: > { %s2262_s5 = sld [smem:[#allocation12_spill]]  ;;  %s1790_s12 = sadd.s32 4294967295, %s1715_s30   ;;  %s1715_s30 = sphi %s1772_s30, %s2312_s30   ;;  %s1711_s29 = sphi %s1770_s29, %s2311_s29   ;;  %s1707_s28 = sphi %s1768_s28, %s2310_s28   ;;  %s1703_s27 = sphi %s1766_s27, %s2309_s27  }
   0x9   : > { %p1378_p0 = scmp.ge.s32.totalorder %s1715_s30, 1  ;;  %p47_p1 = scmp.eq.s32.totalorder %s1790_s12, 0 }
   0xa   : > { %p250_p2 = scmp.lt.s32.totalorder %s1715_s30, 3  ;;  %s1717_s14 = smov [#allocation5]  }
   0xb   : > { %s266_s15 = sshll.u32 %s1717_s14, 4  ;;  %s1718_s16 = smov 64   ;;  %s267_s15 = int_to_ptr.vmem [resolvable:$true] %s266_s15 }
   0xc   : > { %p1795_p3 = pnand %p1378_p0, %p250_p2  ;;  %s1719_s17 = smov 4  }
   0xd   : > { %s1377_s18 = sadd.s32 4294967294, %s1715_s30   ;;  %s1806_s19 = sadd.s32 1, %s1715_s30  }
   0xe   : > { %s264_s11 = sshll.u32 %s2262_s5, 4  ;;  %p1481_p4 = pneg %p1795_p3  ;;  %s265_s11 = int_to_ptr.hbm [resolvable:$true] %s264_s11 }
   0xf   : > { %s33_s20 = sadd.s32 1, %s1711_s29  ;;  %s30_s21 = ssub.s32 %s1715_s30, %s1806_s19 }
  0x10   : > { %p1482_p6 = pnand %p1481_p4, %p47_p1  ;;  %p40_p7 = scmp.ne.s32.totalorder %s1711_s29, %s1707_s28 }
  0x11   : > { %p31_p8 = scmp.eq.s32.totalorder %s30_s21, 0  ;;  %p41_p9 = scmp.eq.s32.totalorder %s1715_s30, 0 }
  0x12   : > { %1484 = dma.hbm_to_vmem [thread:$0]  (!%p1482_p6), %s265_s11, 128, %s267_s15, [#allocation6], %s1718_s16, %s1718_s16, %s1719_s17  }
  0x13   : > { %p46_p10 = scmp.ne.s32.totalorder %s1707_s28, %s1703_s27  ;;  %p211_p11 = scmp.eq.s32.totalorder %s1790_s12, 1 }
  0x14   : > { %s1818_s22 = scalar_select %p31_p8, %s1711_s29, %s33_s20  }
  0x15   : > { %p1822_p12 = por %p47_p1, %p46_p10  ;;  %p1826_p13 = por %p211_p11, %p40_p7 }
  0x16   : > { %2264 = sst [smem:[#allocation11_spill]] %s1818_s22  ;;  %p217_p0 = scmp.eq.s32.totalorder %s1377_s18, 1 }
  0x17   : > { %p42_p2 = por %p41_p9, %p40_p7  ;;  %s283_s25 = sand.u32 1, %s1711_s29  }
  0x18   : > { %p1831_p4 = por %p217_p0, %p46_p10  ;;  %p1494_p6 = scmp.lt.s32.totalorder %s1715_s30, 2 }
  0x19   : > { %s1381_s9 = sshll.u32 %s283_s25, 2  ;;  %s1382_s10 = sshll.u32 %s1715_s30, 2 }
  0x1a   : > { %s291_s15 = scalar_lea.hbm %s2243_s0, %s1382_s10  ;;  %s287_s17 = scalar_lea.vmem [#allocation2], %s1381_s9 }
  0x1b   : > { %s293_s16 = sshll.u32 %s291_s15, 4  ;;  %s295_s20 = sshll.u32 %s287_s17, 4  ;;  %s294_s16 = int_to_ptr.hbm [resolvable:$true] %s293_s16  ;;  %s296_s20 = int_to_ptr.vmem [resolvable:$true] %s295_s20 }
  0x1c   : > { %p1840_p8 = pnand %p1494_p6, %p42_p2  ;;  %s284_s21 = scalar_lea.sflag [#allocation3], %s283_s25 }
  0x1d   : > { %s1615_s5 = sshra.s32 %s294_s16, 4  ;;  %s1622_s9 = scalar_lea.hbm %s2243_s0, 8  ;;  %s1616_s5 = int_to_ptr.hbm [resolvable:$true] %s1615_s5 }
  0x1e   : > { %s1617_s22 = scalar_lea.hbm %s1616_s5, 4  ;;  %p1619_p9 = pneg %p1840_p8 }
  0x1f   : > { %p1618_p7 = scmp.ne.s32.totalorder %s1616_s5, %s1617_s22  ;;  %p1623_p0 = scmp.lt.s32.totalorder %s1616_s5, %s2243_s0 }
  0x20   : > { %p1624_p2 = scmp.lt.s32.totalorder %s1622_s9, %s1617_s22 }
  0x21   : > { %p1620_p10 = pnand %p1619_p9, %p1618_p7 }
  0x22   : > { %p1625_p6 = por %p1624_p2, %p1623_p0 }
  0x23   : > { %p1621_p11 = pneg %p1620_p10 }
  0x25   : > { %p1626_p5 = pnand %p1625_p6, %p1621_p11 }
  0x27   : > { %1629 = shalt.err (!%p1626_p5)
}
  0x28   : > { %1488 = dma.hbm_to_vmem [thread:$0]  (!%p1840_p8), %s294_s16, 64, %s296_s20, %s284_s21  }
  0x29   : > { %331 = sbr.rel (%p1795_p3) target bundleno = 1074 (0x432), region = 48  ;;  %s1857_s25 = sand.u32 (!%p1795_p3), 1, %s1707_s28  }
  0x2a   : > { %s1384_s17 = sshll.u32 (!%p1795_p3), %s1857_s25, 2  ;;  %s334_s10 = scalar_lea.sflag (!%p1795_p3), [#allocation3], %s1857_s25 }
  0x2b   : > { %s337_s11 = scalar_lea.vmem (!%p1795_p3), [#allocation2], %s1384_s17 }
  0x2e   : > { %1690 = dma.done.wait (%p1822_p12), %s334_s10, 64  }
  0x2f   : > { %1692 = vsyncadd (%p1822_p12), %s334_s10, 4294967232 }
  0x30   : > { %1694 = dma.done.wait (%p47_p1), [#allocation6], 128  }
  0x31   : > { %1696 = vsyncadd (%p47_p1), [#allocation6], 4294967168  ;;  %s1870_s5 = sshll.u32 %s1790_s12, 3  ;;  %v1448_v0 = vld [vmem:[%s2247_s4 + $0x8] sm:$0xff]  ;;  %vm500_vm0 = vcmask 1044480   ;;  %v1447_v4 = vld [vmem:[%s2247_s4] sm:$0xff] }
  0x32   : > { %p396_p3 = scmp.lt.s32.totalorder %s1870_s5, 15  ;;  %v1421_v1 = vld [vmem:[#allocation5] sm:$0xf]  ;;  %v1453_v2 = vld [vmem:[#allocation5] sm:$0x10]  ;;  %445 = vmatpush.bf16.msra.mxu0 %v1448_v0  ;;  %vm487_vm1 = vcmask 80896   ;;  %s1229_s17 = scalar_lea.hbm %s2250_s7, %s1870_s5 }
  0x33   : > { %v1422_v3 = vor.u32 %v1453_v2, %v1421_v1  ;;  %v418_v7 = vld [vmem:[%s337_s11] sm:$0xf]  ;;  %vm2252_vm2 = vcmask 261120   ;;  %vm609_vm3 = vcmask 130048   ;;  %vm2259_vm4 = vcmask 1041409   ;;  %p413_p1 = scmp.lt.s32.totalorder %s1790_s12, 1 }
  0x34   : > { %s397_s13 = scalar_select %p396_p3, %s1870_s5, 15  ;;  %v1903_v27 = vld [vmem:[%s2249_s6] ss:$0 sm:$0xff]  ;;  %vm2258_vm5 = vcmask 1042434   ;;  %vm2257_vm6 = vcmask 1043459   ;;  %vm2256_vm7 = vcmask 1044484  }
  0x35   : > { %v502_v5 = vsel %vm500_vm0, %v1422_v3, 0  ;;  %vm2255_vm8 = vcmask 1045509   ;;  %vm2254_vm9 = vcmask 1046534   ;;  %vm2253_vm10 = vcmask 1047559   ;;  %s2314_s12 = smov (!%p413_p1, %s1790_s12), 1  ;;  %s1215_s5 = scalar_lea.sflag [#allocation4], %s1857_s25 }
  0x36   : > { %s1874_s22 = sshll.u32 %s397_s13, 2  ;;  %511 = vmatpush.bf16.msra.mxu1 %v502_v5  ;;  %446 = vmatpush.bf16.msra.mxu0 %v1447_v4  ;;  %vm2260_vm11 = vcmask 64512   ;;  %s1233_s13 = sshll.u32 %s1229_s17, 4  ;;  %s1234_s13 = int_to_ptr.hbm [resolvable:$true] %s1233_s13 }
  0x37   : > { %s411_s21 = scalar_lea.vmem %s2246_s3, %s1874_s22  ;;  %s1891_s10 = scalar_lea.vmem %s2245_s2, %s1874_s22 }
  0x38   : > { %v1449_v6 = vld [vmem:[%s411_s21] sm:$0xff]  ;;  %v1450_v8 = vld [vmem:[%s411_s21 + $0x8] sm:$0xff]  ;;  %v1451_v9 = vld [vmem:[%s411_s21 + $0x10] sm:$0xff]  ;;  %s399_s23 = scalar_lea.vmem %s2244_s1, %s1874_s22  ;;  %s1393_s22 = sshll.u32 %s2314_s12, 3 }
  0x39   : > { %1423 = vmatmul.msk.bf16.vlgmr.msra.gmra.mxu1 %vm487_vm1, %v1449_v6  ;;  %1402 = vmatmul.msk.bf16.vlgmr.msra.gmra.mxu0 %vm2252_vm2, %v418_v7  ;;  %v1452_v10 = vld [vmem:[%s411_s21 + $0x18] sm:$0xff]  ;;  %v1455_v12 = vld [vmem:[%s1891_s10] sm:$0xff]   ;;  %v1470_v26 = vld [vmem:[%s1891_s10 + $0x8] sm:$0xff]   ;;  %s416_s9 = scalar_lea.vmem %s2251_s8, %s1393_s22  ;;  %s1386_s12 = sshll.u32 %s1857_s25, 3 }
  0x3a   : > { %v1456_v16 = vunpack.c.l.bf16 %v1455_v12  ;;  %v1457_v19 = vunpack.c.h.bf16 %v1455_v12  ;;  %v1460_v30 = vunpack.c.l.bf16 %v1470_v26  ;;  %v1461_v40 = vunpack.c.h.bf16 %v1470_v26  ;;  %v1471_v48 = vld [vmem:[%s1891_s10 + $0x10] sm:$0xff]   ;;  %v1472_v3 = vld [vmem:[%s1891_s10 + $0x18] sm:$0xff]   ;;  %s388_s10 = scalar_lea.vmem [#allocation7], %s1386_s12  ;;  %s1659_s16 = sshra.s32 %s1234_s13, 4  ;;  %s1660_s16 = int_to_ptr.hbm [resolvable:$true] %s1659_s16 }
  0x3b   : > { %v1464_v51 = vunpack.c.l.bf16 %v1471_v48  ;;  %v1465_v60 = vunpack.c.h.bf16 %v1471_v48  ;;  %v1468_v6 = vunpack.c.l.bf16 %v1472_v3  ;;  %s1231_s11 = sshll.u32 %s388_s10, 4  ;;  %s1661_s20 = scalar_lea.hbm %s1660_s16, 8  ;;  %s1232_s11 = int_to_ptr.vmem [resolvable:$true] %s1231_s11 }
  0x3c   : > { %p1662_p5 = scmp.ne.s32.totalorder %s1660_s16, %s1661_s20  ;;  %s1665_s18 = scalar_lea.hbm %s2250_s7, 16 }
  0x3d   : > { %p1666_p7 = scmp.lt.s32.totalorder %s1660_s16, %s2250_s7  ;;  %p1667_p9 = scmp.lt.s32.totalorder %s1665_s18, %s1661_s20 }
  0x3e   : > { %p1663_p12 = pnand %p1662_p5, %p1826_p13 }
  0x3f   : > { %p1668_p10 = por %p1667_p9, %p1666_p7 }
  0x40   : > { %p1664_p8 = pneg %p1663_p12 }
  0x42   : > { %p1669_p11 = pnand %p1668_p10, %p1664_p8 }
  0x49   : > { %1424 = vmatmul.msk.bf16.gmra.mxu1 %vm487_vm1, %v1450_v8 }
  0x59   : > { %1425 = vmatmul.msk.bf16.gmra.mxu1 %vm487_vm1, %v1451_v9 }
  0x69   : > { %1426 = vmatmul.msk.bf16.gmra.mxu1 %vm487_vm1, %v1452_v10 }
  0xb6   : > { %v513_v11 = vpop.f32.mrf.mxu1  ;;  %v1894_v13 = vpop.f32.mrf.mxu0 }
  0xb7   : > { %v534_v14 = vrot.slane %v1894_v13, 1  ;;  %v541_v15 = vperm.slane %v1894_v13, 0  ;;  %v535_v23 = vrot.slane %v1894_v13, 2  ;;  %v536_v34 = vrot.slane %v1894_v13, 3 }
  0xb8   : > { %v537_v43 = vrot.slane %v1894_v13, 4  ;;  %v538_v54 = vrot.slane %v1894_v13, 5  ;;  %v539_v1 = vrot.slane %v1894_v13, 6 }
  0xb9   : > { %v542_v17 = vperm.slane %v534_v14, 0  ;;  %v557_v18 = vadd.f32 %v541_v15, %v513_v11  ;;  %v543_v28 = vperm.slane %v535_v23, 0  ;;  %v544_v38 = vperm.slane %v536_v34, 0 }
  0xba   : > { %v545_v49 = vperm.slane %v537_v43, 0  ;;  %v546_v58 = vperm.slane %v538_v54, 0  ;;  %v547_v5 = vperm.slane %v539_v1, 0  ;;  %v540_v11 = vrot.slane %v1894_v13, 7 }
  0xbb   : > { %v581_v20 = vadd.f32 %v1456_v16, %v557_v18  ;;  %v1469_v16 = vunpack.c.h.bf16 %v1472_v3 }
  0xbc   : > { %v548_v15 = vperm.slane %v540_v11, 0 }
  0xbd   : > { %1537 = vtanh.f32 %v581_v20 }
  0xbe   : > { %v515_v21 = vpop.f32.mrf.mxu1  ;;  %v450_v24 = vpop.f32.mrf.mxu0 }
  0xbf   : > { %v558_v22 = vadd.f32 %v542_v17, %v515_v21 }
  0xc1   : > { %v582_v25 = vadd.f32 %v1457_v19, %v558_v22 }
  0xc3   : > { %1539 = vtanh.f32 %v582_v25  ;;  %v1538_v29 = vpop.eup %1537 }
  0xc4   : > { %v601_v32 = vmul.f32 %v1538_v29, %v1903_v27  ;;  %v642_v29 = vlaneseq }
  0xc6   : > { %v518_v31 = vpop.f32.mrf.mxu1  ;;  %v610_v35 = vsel %vm609_vm3, %v601_v32, 0.0 }
  0xc7   : > { %v559_v33 = vadd.f32 %v543_v28, %v518_v31  ;;  %611 = vadd.xlane.f32.xlu0 %v610_v35  ;;  %v1928_v31 = vand.u32 127, %v642_v29 }
  0xc9   : > { %v1540_v36 = vpop.eup %1539  ;;  %v583_v37 = vadd.f32 %v1460_v30, %v559_v33 }
  0xca   : > { %v602_v39 = vmul.f32 %v1540_v36, %v1903_v27 }
  0xcb   : > { %1541 = vtanh.f32 %v583_v37 }
  0xcc   : > { %v613_v44 = vsel %vm609_vm3, %v602_v39, 0.0 }
  0xce   : > { %v520_v41 = vpop.f32.mrf.mxu1 }
  0xcf   : > { %v560_v42 = vadd.f32 %v544_v38, %v520_v41  ;;  %614 = vadd.xlane.f32.xlu0 %v613_v44 }
  0xd1   : > { %v1542_v45 = vpop.eup %1541  ;;  %v584_v46 = vadd.f32 %v1461_v40, %v560_v42 }
  0xd2   : > { %v603_v47 = vmul.f32 %v1542_v45, %v1903_v27 }
  0xd3   : > { %1543 = vtanh.f32 %v584_v46 }
  0xd4   : > { %v616_v50 = vsel %vm609_vm3, %v603_v47, 0.0 }
  0xd5   : > { %617 = vadd.xlane.f32.xlu1 %v616_v50 }
  0xd6   : > { %v523_v52 = vpop.f32.mrf.mxu1 }
  0xd7   : > { %v561_v53 = vadd.f32 %v545_v49, %v523_v52 }
  0xd9   : > { %v1544_v55 = vpop.eup %1543  ;;  %v585_v56 = vadd.f32 %v1464_v51, %v561_v53  ;;  %v1720_v51 = vmov 0  }
  0xda   : > { %v604_v57 = vmul.f32 %v1544_v55, %v1903_v27  ;;  %1535 = vset.pattern.permute.xlu2 %v1720_v51  ;;  %1534 = vset.pattern.permute.xlu1 %v1720_v51 }
  0xdb   : > { %1545 = vtanh.f32 %v585_v56  ;;  %1533 = vset.pattern.permute.xlu0 %v1720_v51 }
  0xdc   : > { %v619_v59 = vsel %vm609_vm3, %v604_v57, 0.0 }
  0xdd   : > { %620 = vadd.xlane.f32.xlu1 %v619_v59 }
  0xde   : > { %v525_v61 = vpop.f32.mrf.mxu1 }
  0xdf   : > { %v562_v62 = vadd.f32 %v546_v58, %v525_v61 }
  0xe1   : > { %v1546_v63 = vpop.eup %1545  ;;  %v586_v0 = vadd.f32 %v1465_v60, %v562_v62 }
  0xe2   : > { %v605_v2 = vmul.f32 %v1546_v63, %v1903_v27 }
  0xe3   : > { %1547 = vtanh.f32 %v586_v0 }
  0xe4   : > { %v622_v4 = vsel %vm609_vm3, %v605_v2, 0.0 }
  0xe5   : > { %623 = vadd.xlane.f32.xlu2 %v622_v4 }
  0xe6   : > { %v528_v7 = vpop.f32.mrf.mxu1 }
  0xe7   : > { %v563_v8 = vadd.f32 %v547_v5, %v528_v7 }
  0xe9   : > { %v1548_v9 = vpop.eup %1547  ;;  %v587_v10 = vadd.f32 %v1468_v6, %v563_v8 }
  0xea   : > { %v606_v12 = vmul.f32 %v1548_v9, %v1903_v27 }
  0xeb   : > { %1549 = vtanh.f32 %v587_v10 }
  0xec   : > { %v625_v14 = vsel %vm609_vm3, %v606_v12, 0.0 }
  0xed   : > { %626 = vadd.xlane.f32.xlu2 %v625_v14 }
  0xee   : > { %v530_v17 = vpop.f32.mrf.mxu1 }
  0xef   : > { %v564_v18 = vadd.f32 %v548_v15, %v530_v17 }
  0xf1   : > { %v1550_v19 = vpop.eup %1549  ;;  %v588_v20 = vadd.f32 %v1469_v16, %v564_v18 }
  0xf2   : > { %v607_v21 = vmul.f32 %v1550_v19, %v1903_v27 }
  0xf3   : > { %1551 = vtanh.f32 %v588_v20 }
  0xf4   : > { %v628_v22 = vsel %vm609_vm3, %v607_v21, 0.0 }
  0xf5   : > { %629 = vadd.xlane.f32.xlu0 %v628_v22 }
  0xf9   : > { %v1552_v23 = vpop.eup %1551 }
  0xfa   : > { %v608_v13 = vmul.f32 %v1552_v23, %v1903_v27 }
  0xfc   : > { %v631_v24 = vsel %vm609_vm3, %v608_v13, 0.0 }
  0xfd   : > { %632 = vadd.xlane.f32.xlu1 %v631_v24 }
 0x13a   : > { %v612_v25 = vpop.xlane.xlu0 %611 }
 0x13b   : > { %v644_v36 = vperm.slane %v612_v25, %v1928_v31 }
 0x142   : > { %v615_v30 = vpop.xlane.xlu0 %614 }
 0x143   : > { %v645_v33 = vperm.slane %v615_v30, %v1928_v31 }
 0x145   : > { %v653_v39 = vsel %vm2259_vm4, %v645_v33, %v644_v36 }
 0x148   : > { %v618_v26 = vpop.xlane.xlu1 %617 }
 0x149   : > { %v646_v34 = vperm.slane %v618_v26, %v1928_v31 }
 0x14b   : > { %v655_v41 = vsel %vm2258_vm5, %v646_v34, %v653_v39 }
 0x150   : > { %v621_v32 = vpop.xlane.xlu1 %620 }
 0x151   : > { %v647_v27 = vperm.slane %v621_v32, %v1928_v31 }
 0x153   : > { %v657_v43 = vsel %vm2257_vm6, %v647_v27, %v655_v41 }
 0x158   : > { %v624_v28 = vpop.xlane.xlu2 %623 }
 0x159   : > { %v648_v38 = vperm.slane %v624_v28, %v1928_v31 }
 0x15b   : > { %v659_v44 = vsel %vm2256_vm7, %v648_v38, %v657_v43 }
 0x160   : > { %v627_v35 = vpop.xlane.xlu2 %626 }
 0x161   : > { %v649_v40 = vperm.slane %v627_v35, %v1928_v31 }
 0x163   : > { %v661_v47 = vsel %vm2255_vm8, %v649_v40, %v659_v44 }
 0x168   : > { %v630_v37 = vpop.xlane.xlu0 %629 }
 0x169   : > { %v650_v42 = vperm.slane %v630_v37, %v1928_v31 }
 0x16b   : > { %v663_v48 = vsel %vm2254_vm9, %v650_v42, %v661_v47 }
 0x170   : > { %v633_v45 = vpop.xlane.xlu1 %632 }
 0x171   : > { %v651_v46 = vperm.slane %v633_v45, %v1928_v31 }
 0x173   : > { %v665_v49 = vsel %vm2253_vm10, %v651_v46, %v663_v48 }
 0x174   : > { %v668_v50 = vsel %vm2260_vm11, %v665_v49, -inf }
 0x175   : > { %669 = vmax.xlane.f32.xlu2 %v668_v50 }
 0x1e8   : > { %v670_v52 = vpop.xlane.xlu2 %669 }
 0x1e9   : > { %v674_v53 = vperm.slane %v670_v52, 2  ;;  %v673_v54 = vperm.slane %v670_v52, 1  ;;  %v672_v55 = vperm.slane %v670_v52, 0  ;;  %v675_v59 = vperm.slane %v670_v52, 3 }
 0x1ea   : > { %v676_v60 = vperm.slane %v670_v52, 4  ;;  %v679_v61 = vperm.slane %v670_v52, 7  ;;  %v677_v5 = vperm.slane %v670_v52, 5  ;;  %v678_v7 = vperm.slane %v670_v52, 6 }
 0x1eb   : > { %v690_v56 = vsub.f32 %v618_v26, %v674_v53  ;;  %v689_v57 = vsub.f32 %v615_v30, %v673_v54  ;;  %v688_v58 = vsub.f32 %v612_v25, %v672_v55  ;;  %v691_v1 = vsub.f32 %v621_v32, %v675_v59 }
 0x1ec   : > { %v692_v2 = vsub.f32 %v624_v28, %v676_v60  ;;  %v695_v3 = vsub.f32 %v633_v45, %v679_v61  ;;  %v693_v12 = vsub.f32 %v627_v35, %v677_v5  ;;  %v694_v14 = vsub.f32 %v630_v37, %v678_v7 }
 0x1ed   : > { %v700_v62 = vmul.f32 1.442695, %v690_v56  ;;  %v698_v63 = vmul.f32 1.442695, %v689_v57  ;;  %v696_v0 = vmul.f32 1.442695, %v688_v58 }
 0x1ee   : > { %v702_v4 = vmul.f32 1.442695, %v691_v1  ;;  %v704_v6 = vmul.f32 1.442695, %v692_v2  ;;  %v710_v9 = vmul.f32 1.442695, %v695_v3 }
 0x1ef   : > { %1553 = vpow2.f32 %v700_v62  ;;  %v706_v15 = vmul.f32 1.442695, %v693_v12  ;;  %v708_v16 = vmul.f32 1.442695, %v694_v14 }
 0x1f0   : > { %1555 = vpow2.f32 %v698_v63 }
 0x1f1   : > { %1557 = vpow2.f32 %v696_v0 }
 0x1f2   : > { %1559 = vpow2.f32 %v702_v4 }
 0x1f3   : > { %1561 = vpow2.f32 %v704_v6 }
 0x1f4   : > { %1563 = vpow2.f32 %v710_v9 }
 0x1f5   : > { %v1946_v8 = vpop.eup %1553  ;;  %1565 = vpow2.f32 %v706_v15 }
 0x1f6   : > { %v1948_v10 = vpop.eup %1555  ;;  %727 = vperm.xlu2 %1535, %v1946_v8   ;;  %1567 = vpow2.f32 %v708_v16 }
 0x1f7   : > { %v1951_v11 = vpop.eup %1557  ;;  %724 = vperm.xlu1 %1534, %v1948_v10  }
 0x1f8   : > { %721 = vperm.xlu0 %1533, %v1951_v11   ;;  %v1955_v17 = vpop.eup %1559 }
 0x1f9   : > { %v1957_v18 = vpop.eup %1561 }
 0x1fa   : > { %v1960_v19 = vpop.eup %1563 }
 0x1fb   : > { %v1964_v20 = vpop.eup %1565 }
 0x1fc   : > { %v1966_v21 = vpop.eup %1567 }
 0x1fe   : > { %730 = vperm.xlu2 %1535, %v1955_v17  }
 0x1ff   : > { %733 = vperm.xlu1 %1534, %v1957_v18  }
 0x200   : > { %742 = vperm.xlu0 %1533, %v1960_v19  }
 0x206   : > { %736 = vperm.xlu2 %1535, %v1964_v20  }
 0x207   : > { %739 = vperm.xlu1 %1534, %v1966_v21  }
 0x250   : > { %v728_v22 = vpop.permute.xlu2 %727 }
 0x251   : > { %v746_v30 = vperm.slane %v728_v22, %v1928_v31 }
 0x258   : > { %v731_v24 = vpop.permute.xlu2 %730 }
 0x259   : > { %v747_v34 = vperm.slane %v731_v24, %v1928_v31 }
 0x260   : > { %v737_v35 = vpop.permute.xlu2 %736 }
 0x261   : > { %v749_v38 = vperm.slane %v737_v35, %v1928_v31 }
 0x269   : > { %v725_v23 = vpop.permute.xlu1 %724 }
 0x26a   : > { %v722_v13 = vpop.permute.xlu0 %721  ;;  %v745_v25 = vperm.slane %v725_v23, %v1928_v31 }
 0x26b   : > { %v744_v26 = vperm.slane %v722_v13, %v1928_v31 }
 0x26d   : > { %v752_v28 = vsel %vm2259_vm4, %v745_v25, %v744_v26 }
 0x26e   : > { %v753_v32 = vsel %vm2258_vm5, %v746_v30, %v752_v28 }
 0x26f   : > { %v754_v36 = vsel %vm2257_vm6, %v747_v34, %v753_v32 }
 0x271   : > { %v734_v29 = vpop.permute.xlu1 %733 }
 0x272   : > { %v748_v33 = vperm.slane %v734_v29, %v1928_v31  ;;  %v743_v37 = vpop.permute.xlu0 %742 }
 0x273   : > { %v751_v41 = vperm.slane %v743_v37, %v1928_v31 }
 0x274   : > { %v755_v27 = vsel %vm2256_vm7, %v748_v33, %v754_v36 }
 0x275   : > { %v756_v42 = vsel %vm2255_vm8, %v749_v38, %v755_v27 }
 0x279   : > { %v740_v39 = vpop.permute.xlu1 %739 }
 0x27a   : > { %v750_v40 = vperm.slane %v740_v39, %v1928_v31 }
 0x27c   : > { %v757_v43 = vsel %vm2254_vm9, %v750_v40, %v756_v42 }
 0x27d   : > { %v758_v44 = vsel %vm2253_vm10, %v751_v41, %v757_v43 }
 0x27e   : > { %v760_v45 = vsel %vm2260_vm11, %v758_v44, 0.0 }
 0x27f   : > { %761 = vadd.xlane.f32.xlu2 %v760_v45 }
 0x2f2   : > { %v762_v46 = vpop.xlane.xlu2 %761 }
 0x2f3   : > { %v1986_v47 = vperm.slane %v762_v46, 0  ;;  %v1988_v48 = vperm.slane %v762_v46, 1  ;;  %v1990_v49 = vperm.slane %v762_v46, 2  ;;  %v1992_v50 = vperm.slane %v762_v46, 3 }
 0x2f4   : > { %v1994_v51 = vperm.slane %v762_v46, 4  ;;  %v1997_v52 = vperm.slane %v762_v46, 5  ;;  %v2003_v55 = vperm.slane %v762_v46, 6  ;;  %v2007_v57 = vperm.slane %v762_v46, 7 }
 0x2f5   : > { %1569 = vrcp.f32 %v1986_v47  ;;  %v836_v53 = vand.u32 2147483648, %v1992_v50  ;;  %v806_v54 = vand.u32 2147483648, %v1988_v48  ;;  %v789_v56 = vand.u32 2147483647, %v1986_v47 }
 0x2f6   : > { %1571 = vrcp.f32 %v1988_v48  ;;  %v804_v58 = vand.u32 2147483647, %v1988_v48  ;;  %v791_v59 = vand.u32 2147483648, %v1986_v47  ;;  %v834_v60 = vand.u32 2147483647, %v1992_v50 }
 0x2f7   : > { %1573 = vrcp.f32 %v1990_v49  ;;  %v819_v61 = vand.u32 2147483647, %v1990_v49  ;;  %v821_v62 = vand.u32 2147483648, %v1990_v49  ;;  %v2016_v0 = vor.u32 1.1754944e-38, %v836_v53 }
 0x2f8   : > { %1575 = vrcp.f32 %v1992_v50  ;;  %vm800_vm12 = vweird.f32 %v1988_v48  ;;  %v807_v1 = vor.u32 1.1754944e-38, %v806_v54  ;;  %vm785_vm13 = vweird.f32 %v1986_v47 }
 0x2f9   : > { %1577 = vrcp.f32 %v1994_v51  ;;  %vm2022_vm14 = vcmp.eq.f32.partialorder %v789_v56, 8.507059e+37  ;;  %vm815_vm15 = vweird.f32 %v1990_v49  ;;  %vm830_vm0 = vweird.f32 %v1992_v50 }
 0x2fa   : > { %1579 = vrcp.f32 %v1997_v52  ;;  %vm2030_vm1 = vcmp.eq.f32.partialorder %v804_v58, 8.507059e+37  ;;  %v792_v9 = vor.u32 1.1754944e-38, %v791_v59  ;;  %vm2035_vm10 = vcmp.eq.f32.partialorder %v819_v61, 8.507059e+37 }
 0x2fb   : > { %v1570_v63 = vpop.eup %1569  ;;  %1581 = vrcp.f32 %v2003_v55  ;;  %v822_v22 = vor.u32 1.1754944e-38, %v821_v62  ;;  %vm2042_vm9 = vcmp.eq.f32.partialorder %v834_v60, 8.507059e+37  ;;  %v849_v42 = vand.u32 2147483647, %v1994_v51 }
 0x2fc   : > { %v1572_v2 = vpop.eup %1571  ;;  %v781_v3 = vmul.f32 %v1570_v63, %v1986_v47  ;;  %1583 = vrcp.f32 %v2007_v57  ;;  %vm786_vm3 = vweird.f32 %v1570_v63  ;;  %v851_v46 = vand.u32 2147483648, %v1994_v51 }
 0x2fd   : > { %v1574_v5 = vpop.eup %1573  ;;  %v796_v6 = vmul.f32 %v1572_v2, %v1988_v48  ;;  %vm801_vm2 = vweird.f32 %v1572_v2  ;;  %vm787_vm7 = vmor %vm785_vm13, %vm786_vm3  ;;  %v864_v4 = vand.u32 2147483647, %v1997_v52 }
 0x2fe   : > { %v1576_v12 = vpop.eup %1575  ;;  %v782_v14 = vsub.f32 1.0, %v781_v3  ;;  %v811_v15 = vmul.f32 %v1574_v5, %v1990_v49  ;;  %vm816_vm8 = vweird.f32 %v1574_v5  ;;  %vm802_vm5 = vmor %vm800_vm12, %vm801_vm2 }
 0x2ff   : > { %v2039_v23 = vpop.eup %1577  ;;  %v826_v13 = vmul.f32 %v1576_v12, %v1992_v50  ;;  %v797_v25 = vsub.f32 1.0, %v796_v6  ;;  %vm831_vm6 = vweird.f32 %v1576_v12  ;;  %vm817_vm13 = vmor %vm815_vm15, %vm816_vm8  ;;  %v852_v6 = vor.u32 1.1754944e-38, %v851_v46 }
 0x300   : > { %v2047_v26 = vpop.eup %1579  ;;  %v783_v28 = vmul.f32 %v1570_v63, %v782_v14  ;;  %v812_v29 = vsub.f32 1.0, %v811_v15  ;;  %v841_v30 = vmul.f32 %v2039_v23, %v1994_v51  ;;  %vm846_vm4 = vweird.f32 %v2039_v23  ;;  %vm832_vm2 = vmor %vm830_vm0, %vm831_vm6 }
 0x301   : > { %v827_v32 = vsub.f32 1.0, %v826_v13  ;;  %v798_v33 = vmul.f32 %v1572_v2, %v797_v25  ;;  %v856_v34 = vmul.f32 %v2047_v26, %v1997_v52  ;;  %v2055_v35 = vpop.eup %1581  ;;  %vm861_vm11 = vweird.f32 %v2047_v26 }
 0x302   : > { %v784_v36 = vadd.f32 %v1570_v63, %v783_v28  ;;  %v813_v27 = vmul.f32 %v1574_v5, %v812_v29  ;;  %v842_v37 = vsub.f32 1.0, %v841_v30  ;;  %v2058_v38 = vpop.eup %1583  ;;  %vm850_vm8 = vcmp.eq.f32.partialorder %v849_v42, 8.507059e+37 }
 0x303   : > { %v828_v39 = vmul.f32 %v1576_v12, %v827_v32  ;;  %v799_v40 = vadd.f32 %v1572_v2, %v798_v33  ;;  %v857_v41 = vsub.f32 1.0, %v856_v34  ;;  %v896_v29 = vand.u32 2147483648, %v2007_v57 }
 0x304   : > { %v788_v43 = vsel %vm787_vm7, %v1570_v63, %v784_v36  ;;  %v814_v44 = vadd.f32 %v1574_v5, %v813_v27  ;;  %v843_v45 = vmul.f32 %v2039_v23, %v842_v37  ;;  %vm2280_vm7 = vweird.f32 %v1997_v52 }
 0x305   : > { %v829_v53 = vadd.f32 %v1576_v12, %v828_v39  ;;  %v803_v54 = vsel %vm802_vm5, %v1572_v2, %v799_v40  ;;  %v793_v56 = vsel %vm2022_vm14, %v792_v9, %v788_v43  ;;  %v858_v47 = vmul.f32 %v2047_v26, %v857_v41 }
 0x306   : > { %v808_v48 = vsel %vm2030_vm1, %v807_v1, %v803_v54  ;;  %v2081_v58 = vmul.f32 %v1951_v11, %v793_v56  ;;  %v818_v59 = vsel %vm817_vm13, %v1574_v5, %v814_v44  ;;  %v844_v60 = vadd.f32 %v2039_v23, %v843_v45 }
 0x307   : > { %v833_v61 = vsel %vm832_vm2, %v1576_v12, %v829_v53  ;;  %v2085_v62 = vmul.f32 %v1948_v10, %v808_v48  ;;  %v823_v49 = vsel %vm2035_vm10, %v822_v22, %v818_v59  ;;  %v859_v63 = vadd.f32 %v2047_v26, %v858_v47  ;;  %v961_v10 = vld [vmem:[%s399_s23 + $0x10] sm:$0xf] }
 0x308   : > { %v838_v50 = vsel %vm2042_vm9, %v2016_v0, %v833_v61  ;;  %v949_v11 = vpack.c.bf16 %v2081_v58, %v2081_v58  ;;  %v2096_v1 = vmul.f32 %v1946_v8, %v823_v49  ;;  %v866_v2 = vand.u32 2147483648, %v1997_v52 }
 0x309   : > { %vm2277_vm5 = vweird.f32 %v1994_v51  ;;  %v839_v3 = vmul.f32 %v1955_v17, %v838_v50  ;;  %v950_v0 = vpack.c.bf16 %v2085_v62, %v2085_v62  ;;  %v886_v17 = vmul.f32 %v2058_v38, %v2007_v57 }
 0x30a   : > { %vm2103_vm6 = vmor %vm2277_vm5, %vm846_vm4  ;;  %v966_v5 = vunpack.c.l.b16 %v949_v11  ;;  %v951_v9 = vpack.c.bf16 %v2096_v1, %v2096_v1  ;;  %v867_v52 = vor.u32 1.1754944e-38, %v866_v2  ;;  %vm865_vm9 = vcmp.eq.f32.partialorder %v864_v4, 8.507059e+37 }
 0x30b   : > { %v848_v8 = vsel %vm2103_vm6, %v2039_v23, %v844_v60  ;;  %vm2118_vm4 = vmor %vm2280_vm7, %vm861_vm11  ;;  %918 = vperm.xlu2 %1535, %v839_v3   ;;  %v995_v7 = vunpack.c.l.b16 %v950_v0  ;;  %v887_v16 = vsub.f32 1.0, %v886_v17  ;;  %v952_v23 = vpack.c.bf16 %v839_v3, %v839_v3  ;;  %v964_v0 = vld [vmem:[%s399_s23 + $0x1c] sm:$0xf]  ;;  %v963_v17 = vld [vmem:[%s399_s23 + $0x18] sm:$0xf] }
 0x30c   : > { %v863_v12 = vsel %vm2118_vm4, %v2047_v26, %v859_v63  ;;  %v1427_v14 = vunpack.i.l.s16 %v966_v5  ;;  %v853_v15 = vsel %vm850_vm8, %v852_v6, %v848_v8  ;;  %v1023_v25 = vunpack.c.l.b16 %v951_v9  ;;  %v962_v5 = vld [vmem:[%s399_s23 + $0x14] sm:$0xf] }
 0x30d   : > { %v1429_v22 = vunpack.i.l.s16 %v995_v7  ;;  %v868_v13 = vsel %vm865_vm9, %v867_v52, %v863_v12  ;;  %v888_v24 = vmul.f32 %v2058_v38, %v887_v16  ;;  %v854_v28 = vmul.f32 %v1957_v18, %v853_v15 }
 0x30e   : > { %970 = vperm.xlu1 %1534, %v1427_v14   ;;  %vm891_vm10 = vweird.f32 %v2058_v38  ;;  %v871_v30 = vmul.f32 %v2055_v35, %v2003_v55  ;;  %v1051_v32 = vunpack.c.l.b16 %v952_v23  ;;  %v869_v33 = vmul.f32 %v1964_v20, %v868_v13 }
 0x30f   : > { %999 = vperm.xlu0 %1533, %v1429_v22   ;;  %v889_v26 = vadd.f32 %v2058_v38, %v888_v24  ;;  %vm890_vm11 = vweird.f32 %v2007_v57  ;;  %v894_v34 = vand.u32 2147483647, %v2007_v57  ;;  %v1431_v27 = vunpack.i.l.s16 %v1023_v25 }
 0x310   : > { %vm892_vm12 = vmor %vm890_vm11, %vm891_vm10  ;;  %v872_v36 = vsub.f32 1.0, %v871_v30  ;;  %v953_v18 = vpack.c.bf16 %v854_v28, %v854_v28  ;;  %v881_v39 = vand.u32 2147483648, %v2003_v55  ;;  %v897_v40 = vor.u32 1.1754944e-38, %v896_v29 }
 0x311   : > { %v893_v37 = vsel %vm892_vm12, %v2058_v38, %v889_v26  ;;  %vm876_vm14 = vweird.f32 %v2055_v35  ;;  %v879_v42 = vand.u32 2147483647, %v2003_v55  ;;  %v1433_v20 = vunpack.i.l.s16 %v1051_v32 }
 0x312   : > { %v873_v41 = vmul.f32 %v2055_v35, %v872_v36  ;;  %v954_v43 = vpack.c.bf16 %v869_v33, %v869_v33  ;;  %vm895_vm15 = vcmp.eq.f32.partialorder %v894_v34, 8.507059e+37  ;;  %vm875_vm0 = vweird.f32 %v2003_v55 }
 0x313   : > { %v898_v57 = vsel %vm895_vm15, %v897_v40, %v893_v37  ;;  %vm877_vm1 = vmor %vm875_vm0, %vm876_vm14  ;;  %v882_v38 = vor.u32 1.1754944e-38, %v881_v39  ;;  %v1079_v45 = vunpack.c.l.b16 %v953_v18  ;;  %vm880_vm3 = vcmp.eq.f32.partialorder %v879_v42, 8.507059e+37 }
 0x314   : > { %v874_v44 = vadd.f32 %v2055_v35, %v873_v41  ;;  %v1107_v53 = vunpack.c.l.b16 %v954_v43  ;;  %v899_v54 = vmul.f32 %v1960_v19, %v898_v57  ;;  %v957_v19 = vld [vmem:[%s399_s23] sm:$0xf]  ;;  %vm977_vm13 = vcmask 1043456  }
 0x315   : > { %v1435_v48 = vunpack.i.l.s16 %v1079_v45  ;;  %v1091_v3 = vsel %vm977_vm13, %v961_v10, 0  ;;  %v1175_v4 = vsel %vm977_vm13, %v964_v0, 0  ;;  %v1119_v12 = vsel %vm977_vm13, %v962_v5, 0 }
 0x316   : > { %1027 = vperm.xlu1 %1534, %v1431_v27   ;;  %v878_v46 = vsel %vm877_vm1, %v2055_v35, %v874_v44  ;;  %v1437_v60 = vunpack.i.l.s16 %v1107_v53  ;;  %v956_v61 = vpack.c.bf16 %v899_v54, %v899_v54  ;;  %v979_v35 = vsel %vm977_vm13, %v957_v19, 0  ;;  %1100 = vmatpush.bf16.msrb.mxu0 %v1091_v3 }
 0x317   : > { %1055 = vperm.xlu0 %1533, %v1433_v20   ;;  %v883_v56 = vsel %vm880_vm3, %v882_v38, %v878_v46  ;;  %988 = vmatpush.bf16.msra.mxu2 %v979_v35  ;;  %v1147_v52 = vsel %vm977_vm13, %v963_v17, 0  ;;  %vm2283_vm2 = vcmask 64512   ;;  %vm2291_vm11 = vcmask 1041409  }
 0x318   : > { %v884_v47 = vmul.f32 %v1966_v21, %v883_v56  ;;  %v1163_v49 = vunpack.c.l.b16 %v956_v61  ;;  %v958_v21 = vld [vmem:[%s399_s23 + $0x4] sm:$0xf]  ;;  %vm2284_vm5 = vmmov %vm2283_vm2  ;;  %vm2292_vm12 = vcmask 1042434   ;;  %vm2293_vm14 = vcmask 1043459  }
 0x319   : > { %v1007_v11 = vsel %vm977_vm13, %v958_v21, 0  ;;  %vm2285_vm6 = vmmov %vm2283_vm2  ;;  %vm2294_vm15 = vcmask 1044484   ;;  %vm2295_vm0 = vcmask 1045509   ;;  %vm2296_vm1 = vcmask 1046534  }
 0x31a   : > { %v955_v59 = vpack.c.bf16 %v884_v47, %v884_v47  ;;  %v1441_v50 = vunpack.i.l.s16 %v1163_v49  ;;  %1016 = vmatpush.bf16.msra.mxu3 %v1007_v11  ;;  %1184 = vmatpush.bf16.msra.mxu0 %v1175_v4  ;;  %vm2286_vm7 = vmmov %vm2283_vm2  ;;  %vm2297_vm3 = vcmask 1047559  }
 0x31b   : > { %vm2287_vm4 = vmmov %vm2283_vm2 }
 0x31c   : > { %v1135_v55 = vunpack.c.l.b16 %v955_v59  ;;  %vm2288_vm8 = vmmov %vm2283_vm2 }
 0x31d   : > { %vm2289_vm9 = vmmov %vm2283_vm2 }
 0x31e   : > { %1083 = vperm.xlu1 %1534, %v1435_v48   ;;  %v1439_v63 = vunpack.i.l.s16 %v1135_v55  ;;  %vm2290_vm10 = vmmov %vm2283_vm2 }
 0x31f   : > { %1111 = vperm.xlu0 %1533, %v1437_v60  }
 0x326   : > { %1139 = vperm.xlu1 %1534, %v1439_v63  }
 0x327   : > { %1167 = vperm.xlu0 %1533, %v1441_v50  }
 0x32e   : > { %909 = vperm.xlu1 %1534, %v2081_v58   ;;  %v959_v58 = vld [vmem:[%s399_s23 + $0x8] sm:$0xf] }
 0x32f   : > { %912 = vperm.xlu0 %1533, %v2085_v62   ;;  %v960_v62 = vld [vmem:[%s399_s23 + $0xc] sm:$0xf] }
 0x330   : > { %v1063_v2 = vsel %vm977_vm13, %v960_v62, 0 }
 0x331   : > { %1072 = vmatpush.bf16.msrb.mxu3 %v1063_v2 }
 0x336   : > { %915 = vperm.xlu1 %1534, %v2096_v1   ;;  %v1035_v1 = vsel %vm977_vm13, %v959_v58, 0  ;;  %vm2298_vm13 = vmmov %vm2283_vm2 }
 0x337   : > { %921 = vperm.xlu0 %1533, %v854_v28   ;;  %1044 = vmatpush.bf16.msrb.mxu2 %v1035_v1 }
 0x33e   : > { %924 = vperm.xlu1 %1534, %v869_v33  }
 0x33f   : > { %927 = vperm.xlu0 %1533, %v884_v47  }
 0x346   : > { %930 = vperm.xlu1 %1534, %v899_v54  }
 0x365   : > { %v919_v44 = vpop.permute.xlu2 %918 }
 0x366   : > { %v935_v53 = vperm.slane %v919_v44, %v1928_v31 }
 0x380   : > { %v971_v8 = vpop.permute.xlu1 %970 }
 0x381   : > { %v1000_v51 = vpop.permute.xlu0 %999  ;;  %v972_v6 = vperm.slane %v971_v8, %v1928_v31 }
 0x382   : > { %v1001_v7 = vperm.slane %v1000_v51, %v1928_v31 }
 0x383   : > { %v973_v9 = vpack.c.b16 %v972_v6, %v972_v6 }
 0x384   : > { %v1002_v14 = vpack.c.b16 %v1001_v7, %v1001_v7 }
 0x385   : > { %1428 = vmatmul.msk.bf16.vlgmr.msra.gmra.mxu2 %vm2283_vm2, %v973_v9  ;;  %vm2299_vm2 = vmmov %vm2291_vm11 }
 0x386   : > { %1430 = vmatmul.msk.bf16.vlgmr.msra.gmra.mxu3 %vm2284_vm5, %v1002_v14  ;;  %1128 = vmatpush.bf16.msra.mxu2 %v1119_v12  ;;  %vm2300_vm5 = vmmov %vm2292_vm12 }
 0x387   : > { %1156 = vmatpush.bf16.msra.mxu3 %v1147_v52 }
 0x388   : > { %v1028_v15 = vpop.permute.xlu1 %1027 }
 0x389   : > { %v1056_v16 = vpop.permute.xlu0 %1055  ;;  %v1029_v22 = vperm.slane %v1028_v15, %v1928_v31 }
 0x38a   : > { %v1057_v23 = vperm.slane %v1056_v16, %v1928_v31 }
 0x38b   : > { %v1030_v28 = vpack.c.b16 %v1029_v22, %v1029_v22 }
 0x38c   : > { %v1058_v29 = vpack.c.b16 %v1057_v23, %v1057_v23 }
 0x390   : > { %v1084_v13 = vpop.permute.xlu1 %1083 }
 0x391   : > { %v1112_v24 = vpop.permute.xlu0 %1111  ;;  %v1085_v25 = vperm.slane %v1084_v13, %v1928_v31 }
 0x392   : > { %v1113_v33 = vperm.slane %v1112_v24, %v1928_v31 }
 0x393   : > { %v1086_v26 = vpack.c.b16 %v1085_v25, %v1085_v25 }
 0x394   : > { %v1114_v37 = vpack.c.b16 %v1113_v33, %v1113_v33 }
 0x395   : > { %1432 = vmatmul.msk.bf16.vlgmr.msrb.gmra.mxu2 %vm2285_vm6, %v1030_v28  ;;  %1436 = vmatmul.msk.bf16.vlgmr.msrb.gmra.mxu0 %vm2286_vm7, %v1086_v26  ;;  %vm2301_vm6 = vmmov %vm2293_vm14 }
 0x396   : > { %1434 = vmatmul.msk.bf16.vlgmr.msrb.gmra.mxu3 %vm2287_vm4, %v1058_v29  ;;  %vm2302_vm7 = vmmov %vm2294_vm15 }
 0x397   : > { %vm2303_vm4 = vmmov %vm2295_vm0 }
 0x398   : > { %v1140_v30 = vpop.permute.xlu1 %1139 }
 0x399   : > { %v1168_v32 = vpop.permute.xlu0 %1167  ;;  %v1141_v36 = vperm.slane %v1140_v30, %v1928_v31 }
 0x39a   : > { %v1169_v34 = vperm.slane %v1168_v32, %v1928_v31 }
 0x39b   : > { %v1142_v40 = vpack.c.b16 %v1141_v36, %v1141_v36 }
 0x39c   : > { %v1170_v39 = vpack.c.b16 %v1169_v34, %v1169_v34 }
 0x3a0   : > { %v910_v27 = vpop.permute.xlu1 %909 }
 0x3a1   : > { %v913_v18 = vpop.permute.xlu0 %912  ;;  %v932_v43 = vperm.slane %v910_v27, %v1928_v31 }
 0x3a2   : > { %v933_v20 = vperm.slane %v913_v18, %v1928_v31 }
 0x3a4   : > { %v940_v38 = vsel %vm2291_vm11, %v933_v20, %v932_v43 }
 0x3a5   : > { %1438 = vmatmul.msk.bf16.vlgmr.msra.gmra.mxu2 %vm2288_vm8, %v1114_v37  ;;  %1442 = vmatmul.msk.bf16.vlgmr.msra.gmra.mxu0 %vm2289_vm9, %v1170_v39  ;;  %vm2304_vm8 = vmmov %vm2296_vm1 }
 0x3a6   : > { %1440 = vmatmul.msk.bf16.vlgmr.msra.gmra.mxu3 %vm2290_vm10, %v1142_v40  ;;  %vm2305_vm9 = vmmov %vm2297_vm3  ;;  %vm2306_vm10 = vcmask 261120  }
 0x3a8   : > { %v916_v41 = vpop.permute.xlu1 %915 }
 0x3a9   : > { %v922_v42 = vpop.permute.xlu0 %921  ;;  %v934_v57 = vperm.slane %v916_v41, %v1928_v31 }
 0x3aa   : > { %v936_v48 = vperm.slane %v922_v42, %v1928_v31 }
 0x3ab   : > { %v941_v45 = vsel %vm2292_vm12, %v934_v57, %v940_v38 }
 0x3ac   : > { %v942_v54 = vsel %vm2293_vm14, %v935_v53, %v941_v45 }
 0x3ad   : > { %v943_v60 = vsel %vm2294_vm15, %v936_v48, %v942_v54 }
 0x3b0   : > { %v925_v46 = vpop.permute.xlu1 %924 }
 0x3b1   : > { %v928_v56 = vpop.permute.xlu0 %927  ;;  %v937_v47 = vperm.slane %v925_v46, %v1928_v31 }
 0x3b2   : > { %v938_v59 = vperm.slane %v928_v56, %v1928_v31 }
 0x3b3   : > { %v944_v61 = vsel %vm2295_vm0, %v937_v47, %v943_v60 }
 0x3b4   : > { %v945_v63 = vsel %vm2296_vm1, %v938_v59, %v944_v61 }
 0x3b8   : > { %v931_v55 = vpop.permute.xlu1 %930 }
 0x3b9   : > { %v939_v49 = vperm.slane %v931_v55, %v1928_v31 }
 0x3bb   : > { %v946_v50 = vsel %vm2297_vm3, %v939_v49, %v945_v63 }
 0x3bc   : > { %948 = vst.msk [vmem:[%s416_s9] sm:$0xff] %vm2298_vm13, %v946_v50 }
 0x408   : > { %v990_v19 = vpop.f32.mrf.mxu2 }
 0x409   : > { %v1018_v21 = vpop.f32.mrf.mxu3 }
 0x40a   : > { %v1198_v10 = vrot.slane %v1018_v21, 7 }
 0x40c   : > { %v1199_v8 = vsel %vm2299_vm2, %v1198_v10, %v990_v19 }
 0x410   : > { %v992_v35 = vpop.f32.mrf.mxu2 }
 0x411   : > { %v1020_v11 = vpop.f32.mrf.mxu3 }
 0x412   : > { %v1102_v58 = vpop.f32.mrf.mxu0 }
 0x413   : > { %v1204_v17 = vrot.slane %v1102_v58, 4 }
 0x418   : > { %v1046_v62 = vpop.f32.mrf.mxu2 }
 0x419   : > { %v1074_v1 = vpop.f32.mrf.mxu3  ;;  %v1200_v3 = vrot.slane %v1046_v62, 6 }
 0x41a   : > { %v1104_v2 = vpop.f32.mrf.mxu0  ;;  %v1202_v5 = vrot.slane %v1074_v1, 5 }
 0x41b   : > { %v1201_v51 = vsel %vm2300_vm5, %v1200_v3, %v1199_v8 }
 0x41c   : > { %v1203_v6 = vsel %vm2301_vm6, %v1202_v5, %v1201_v51 }
 0x41d   : > { %v1205_v14 = vsel %vm2302_vm7, %v1204_v17, %v1203_v6 }
 0x420   : > { %v1048_v0 = vpop.f32.mrf.mxu2 }
 0x421   : > { %v1076_v31 = vpop.f32.mrf.mxu3 }
 0x422   : > { %v1186_v4 = vpop.f32.mrf.mxu0 }
 0x423   : > { %v1210_v16 = vrot.slane %v1186_v4, 1 }
 0x428   : > { %v1130_v7 = vpop.f32.mrf.mxu2 }
 0x429   : > { %v1206_v9 = vrot.slane %v1130_v7, 3  ;;  %v1158_v12 = vpop.f32.mrf.mxu3 }
 0x42a   : > { %v1208_v52 = vrot.slane %v1158_v12, 2  ;;  %v1188_v15 = vpop.f32.mrf.mxu0 }
 0x42b   : > { %v1207_v22 = vsel %vm2303_vm4, %v1206_v9, %v1205_v14 }
 0x42c   : > { %v1209_v23 = vsel %vm2304_vm8, %v1208_v52, %v1207_v22 }
 0x42d   : > { %v1211_v13 = vsel %vm2305_vm9, %v1210_v16, %v1209_v23 }
 0x42e   : > { %1213 = vst.msk [vmem:[%s388_s10] sm:$0xff] %vm2306_vm10, %v1211_v13 }
 0x42f   : > { %1672 = shalt.err (!%p1669_p11)
}
 0x430   : > { %1479 = dma.vmem_to_hbm [thread:$0]  (%p1826_p13), %s1232_s11, 128, %s1234_s13, %s1215_s5   ;;  %v1132_v24 = vpop.f32.mrf.mxu2 }
 0x431   : > { %v1160_v25 = vpop.f32.mrf.mxu3 }
 0x432 PF: > { %s1248_s25 = sand.u32 1, %s1703_s27   ;;  %p2307_p0 = scmp.ge.s32.totalorder %s1715_s30, 2 }
 0x433   : > { %s1249_s12 = scalar_lea.sflag [#allocation4], %s1248_s25 }
 0x434   : > { %p1490_p2 = pnand %p2307_p0, %p1831_p4 }
 0x436   : > { %p1491_p6 = pneg %p1490_p2 }
 0x438   : > { %1698 = dma.done.wait (%p1491_p6), %s1249_s12, 128  }
 0x439   : > { %1700 = vsyncadd (%p1491_p6), %s1249_s12, 4294967168  ;;  %s2308_s14 = sld [smem:[#allocation11_spill]]  ;;  %p23_p13 = scmp.ge.s32.totalorder %s1806_s19, 4  }
 0x43a   : > { %s2309_s27 = smov %s1707_s28  ;;  %s2310_s28 = smov %s1711_s29 }
 0x43b   : > { %s2312_s30 = smov %s1806_s19  ;;  %25 = sbr.rel (!%p23_p13) target bundleno = 8 (0x8), region = 118 }
 0x43f   : > { %s2311_s29 = smov %s2308_s14 }
 0x440   :  { %1262 = vsyncpa [#allocation3], 1 }
 0x441   :  { %1264 = vsyncpa [#allocation3 + $0x1], 1 }
 0x442   :  { %1265 = vsyncpa [#allocation6], 1 }
 0x443   :  { %1266 = vsyncpa [#allocation4], 1 }
 0x444   :  { %1268 = vsyncpa [#allocation4 + $0x1], 1 }

</bundles_post_ra>
